<compile_context>
chip_gen: v7x
topology: tpu7x:2x2x1
jax: 0.10.0
libtpu: 0.0.40
codegen_flags: <defaults>
</compile_context>

<pallas_src>
import jax
import jax.numpy as jnp
from jax import lax
from jax.experimental import pallas as pl
from jax.experimental.pallas import tpu as pltpu


def _round_up(x, m):
    return ((x + m - 1) // m) * m


# -----------------------------------------------------------------------------
# GEMM kernel: A streamed (tm, tk), B resident (KC_pad, Cout_pad), fused BN bias.
# -----------------------------------------------------------------------------
def _matmul_bn_kernel(a_ref, b_ref, bias_ref, o_ref, acc_ref):
    # a_ref:    (tm, tk)             im2col patches tile (streamed)
    # b_ref:    (KC_pad, Cout_pad)   BN-scale-folded weights (VMEM resident)
    # bias_ref: (1, Cout_pad)        folded BN bias (f32, resident)
    # o_ref:    (tm, Cout_pad)
    # acc_ref:  (tm, Cout_pad)       f32 accumulator (persists across k axis)
    k = pl.program_id(1)
    tk = a_ref.shape[1]

    @pl.when(k == 0)
    def _():
        acc_ref[...] = jnp.zeros_like(acc_ref)

    k_start = pl.multiple_of(k * tk, tk)
    acc_ref[...] += jnp.dot(a_ref[...], b_ref[pl.ds(k_start, tk), :],
                            preferred_element_type=jnp.float32)

    @pl.when(k == pl.num_programs(1) - 1)
    def _():
        o_ref[...] = (acc_ref[...] + bias_ref[...]).astype(o_ref.dtype)


# -----------------------------------------------------------------------------
# Depthwise kernel: per-channel VPU tap accumulation over a padded image slab.
# -----------------------------------------------------------------------------
def _make_depthwise_bn_kernel(K, Ho, Wo):
    def kernel(x_ref, w_ref, bias_ref, o_ref):
        # x_ref:    (1, Hp, Wp, tc)  padded NHWC slab (one image, tc channels)
        # w_ref:    (K*K, tc)        BN-scale-folded depthwise taps (f32)
        # bias_ref: (1, tc)          folded BN bias (f32)
        # o_ref:    (1, Ho, Wo, tc)
        tc = o_ref.shape[3]
        acc = jnp.zeros((Ho, Wo, tc), jnp.float32)
        for kh in range(K):
            for kw in range(K):
                tap = x_ref[0, kh:kh + Ho, kw:kw + Wo, :].astype(jnp.float32)
                acc = acc + tap * w_ref[kh * K + kw, :]
        o_ref[...] = (acc + bias_ref[0, :])[None].astype(o_ref.dtype)
    return kernel


# -----------------------------------------------------------------------------
# General / grouped path: im2col GEMM.
# -----------------------------------------------------------------------------
def _conv_bn_gemm(x_nchw, weight_oihw, scale, bias, *, stride, groups,
                  compute_dtype):
    N, Cin, H, W = x_nchw.shape
    Cout, cpg_in, K, _ = weight_oihw.shape
    cpg_out = Cout // groups
    pad = (K - 1) // 2
    Ho = (H + 2 * pad - K) // stride + 1
    Wo = (W + 2 * pad - K) // stride + 1

    # Layout glue + im2col, in the compute dtype (single pad, no extra f32 copy).
    x_nhwc = jnp.transpose(x_nchw, (0, 2, 3, 1)).astype(compute_dtype)
    x_pad = jnp.pad(x_nhwc, ((0, 0), (pad, pad), (pad, pad), (0, 0)))
    cols = []
    for kh in range(K):
        for kw in range(K):
            cols.append(x_pad[:, kh:kh + (Ho - 1) * stride + 1:stride,
                                 kw:kw + (Wo - 1) * stride + 1:stride, :])
    M = N * Ho * Wo
    KC = K * K * Cin
    patches = jnp.concatenate(cols, axis=-1).reshape(M, KC)

    # Expand (possibly grouped) weights to dense HWIO (K, K, Cin, Cout).
    w_hwio_g = jnp.transpose(weight_oihw, (2, 3, 1, 0)).astype(jnp.float32)
    if groups == 1:
        w_hwio = w_hwio_g
    else:
        ci = jnp.arange(Cin)[:, None]                       # (Cin, 1)
        co = jnp.arange(Cout)[None, :]                      # (1, Cout)
        g_of_co = co // cpg_out
        in_group = (ci // cpg_in) == g_of_co                # (Cin, Cout)
        j = jnp.clip(ci - g_of_co * cpg_in, 0, cpg_in - 1)
        co_b = jnp.broadcast_to(co, (Cin, Cout))
        w_hwio = jnp.where(in_group[None, None],
                           w_hwio_g[:, :, j, co_b], 0.0)    # block-diagonal dense
    w_folded = (w_hwio * scale[None, None, None, :]).reshape(KC, Cout)

    # Lane-dense, MXU-friendly padding and tile sizes.
    Cout_pad = _round_up(Cout, 256) if Cout > 128 else 128   # 256-align when wide
    KC_pad = _round_up(KC, 128)
    q = KC_pad // 128                                        # tk: largest 128-mult
    tk = 128                                                 # divisor of KC_pad,
    for cand in range(min(16, q), 0, -1):                    # capped at 2048
        if q % cand == 0:
            tk = 128 * cand
            break
    if M >= 1024:
        tm = 512
    elif M >= 512:
        tm = 256
    else:
        tm = _round_up(M, 16)      # bf16 min sublane tile is 16
    M_pad = _round_up(M, tm)

    a = jnp.pad(patches, ((0, M_pad - M), (0, KC_pad - KC)))
    b = jnp.pad(w_folded.astype(compute_dtype),
                ((0, KC_pad - KC), (0, Cout_pad - Cout)))
    bias_p = jnp.pad(bias[None, :].astype(jnp.float32),
                     ((0, 0), (0, Cout_pad - Cout)))

    grid = (M_pad // tm, KC_pad // tk)

    out = pl.pallas_call(
        _matmul_bn_kernel,
        out_shape=jax.ShapeDtypeStruct((M_pad, Cout_pad), x_nchw.dtype),
        grid_spec=pltpu.PrefetchScalarGridSpec(
            num_scalar_prefetch=0,
            grid=grid,
            in_specs=[
                pl.BlockSpec((tm, tk), lambda i, k: (i, k)),            # A: one pass
                pl.BlockSpec((KC_pad, Cout_pad), lambda i, k: (0, 0)),  # B: resident
                pl.BlockSpec((1, Cout_pad), lambda i, k: (0, 0)),       # bias: resident
            ],
            out_specs=pl.BlockSpec((tm, Cout_pad), lambda i, k: (i, 0)),
            scratch_shapes=[pltpu.VMEM((tm, Cout_pad), jnp.float32)],
        ),
        compiler_params=pltpu.CompilerParams(
            dimension_semantics=("parallel", "arbitrary"),
            vmem_limit_bytes=48 * 1024 * 1024,
        ),
    )(a, b, bias_p)

    out = out[:M, :Cout].reshape(N, Ho, Wo, Cout)
    return jnp.transpose(out, (0, 3, 1, 2))


# -----------------------------------------------------------------------------
# Depthwise path: groups == Cin == Cout, stride == 1.
# -----------------------------------------------------------------------------
def _conv_bn_depthwise(x_nchw, weight_oihw, scale, bias, *, compute_dtype):
    N, C, H, W = x_nchw.shape
    Cout, _, K, _ = weight_oihw.shape
    pad = (K - 1) // 2
    Ho, Wo = H, W
    Hp, Wp = H + 2 * pad, W + 2 * pad

    tc = 128
    C_pad = _round_up(C, tc)

    x_nhwc = jnp.transpose(x_nchw, (0, 2, 3, 1)).astype(compute_dtype)
    x_p = jnp.pad(x_nhwc, ((0, 0), (pad, pad), (pad, pad), (0, C_pad - C)))

    # (K*K, C) folded depthwise taps, kept in f32 for exact VPU accumulation.
    w_kkc = jnp.transpose(weight_oihw[:, 0, :, :], (1, 2, 0)).reshape(K * K, Cout)
    w_kkc = w_kkc.astype(jnp.float32) * scale[None, :]
    w_p = jnp.pad(w_kkc, ((0, 0), (0, C_pad - C)))
    bias_p = jnp.pad(bias[None, :].astype(jnp.float32), ((0, 0), (0, C_pad - C)))

    grid = (N, C_pad // tc)

    out = pl.pallas_call(
        _make_depthwise_bn_kernel(K, Ho, Wo),
        out_shape=jax.ShapeDtypeStruct((N, Ho, Wo, C_pad), x_nchw.dtype),
        grid_spec=pltpu.PrefetchScalarGridSpec(
            num_scalar_prefetch=0,
            grid=grid,
            in_specs=[
                pl.BlockSpec((1, Hp, Wp, tc), lambda n, c: (n, 0, 0, c)),
                pl.BlockSpec((K * K, tc), lambda n, c: (0, c)),
                pl.BlockSpec((1, tc), lambda n, c: (0, c)),
            ],
            out_specs=pl.BlockSpec((1, Ho, Wo, tc), lambda n, c: (n, 0, 0, c)),
        ),
        compiler_params=pltpu.CompilerParams(
            dimension_semantics=("parallel", "parallel"),
            vmem_limit_bytes=48 * 1024 * 1024,
        ),
    )(x_p, w_p, bias_p)

    out = out[:, :, :, :C]
    return jnp.transpose(out, (0, 3, 1, 2))


# -----------------------------------------------------------------------------
# Public entry point: ConvBNLayer.forward (eval-mode BN with running stats).
# -----------------------------------------------------------------------------
def conv_bn_forward(x_nchw, weight_oihw, gamma, beta, running_mean, running_var,
                    *, stride=1, groups=1, eps=1e-5, compute_dtype=jnp.bfloat16):
    """x_nchw: (N, Cin, H, W); weight_oihw: (Cout, Cin//groups, K, K);
    gamma/beta/running_mean/running_var: (Cout,)."""
    N, Cin, H, W = x_nchw.shape
    Cout, cpg_in, K, _ = weight_oihw.shape
    assert Cin % groups == 0 and Cout % groups == 0
    assert cpg_in == Cin // groups
    assert K % 2 == 1, "padding=(K-1)//2 reproduces nn.Conv2d only for odd K here"

    # Fold BatchNorm (eval / running stats): y = scale * conv(x) + bias.
    inv_std = lax.rsqrt(running_var.astype(jnp.float32) + eps)
    scale = gamma.astype(jnp.float32) * inv_std
    bias = beta.astype(jnp.float32) - running_mean.astype(jnp.float32) * scale

    if groups > 1 and groups == Cin and Cout == Cin and stride == 1:
        return _conv_bn_depthwise(x_nchw, weight_oihw, scale, bias,
                                  compute_dtype=compute_dtype)
    return _conv_bn_gemm(x_nchw, weight_oihw, scale, bias, stride=stride,
                         groups=groups, compute_dtype=compute_dtype)


# -----------------------------------------------------------------------------
# Reference + tests.
# -----------------------------------------------------------------------------
def _reference(x, w, gamma, beta, mean, var, *, stride, groups=1, eps=1e-5):
    K = w.shape[-1]
    pad = (K - 1) // 2
    y = lax.conv_general_dilated(
        x, w, window_strides=(stride, stride),
        padding=[(pad, pad), (pad, pad)],
        dimension_numbers=("NCHW", "OIHW", "NCHW"),
        feature_group_count=groups,
    )
    inv_std = 1.0 / jnp.sqrt(var + eps)
    scale = gamma * inv_std
    return scale[None, :, None, None] * y + (beta - mean * scale)[None, :, None, None]


def _run_case(key, *, N, Cin, H, W, Cout, K, stride, groups, compute_dtype,
              atol, rtol):
    kx, kw, kg, kb, km, kv = jax.random.split(key, 6)
    x = jax.random.normal(kx, (N, Cin, H, W), dtype=jnp.float32)
    w = jax.random.normal(kw, (Cout, Cin // groups, K, K), dtype=jnp.float32) * 0.1
    gamma = jax.random.normal(kg, (Cout,), dtype=jnp.float32) * 0.1 + 1.0
    beta = jax.random.normal(kb, (Cout,), dtype=jnp.float32) * 0.1
    mean = jax.random.normal(km, (Cout,), dtype=jnp.float32) * 0.1
    var = jax.random.uniform(kv, (Cout,), dtype=jnp.float32, minval=0.5, maxval=1.5)

    out = conv_bn_forward(x, w, gamma, beta, mean, var, stride=stride,
                          groups=groups, compute_dtype=compute_dtype)
    out = jax.block_until_ready(out)

    ref = _reference(x, w, gamma, beta, mean, var, stride=stride, groups=groups)
    assert out.shape == ref.shape, (out.shape, ref.shape)
    max_err = jnp.max(jnp.abs(out - ref))
    assert jnp.allclose(out, ref, atol=atol, rtol=rtol), \
        f"max abs err {max_err} (K={K}, stride={stride}, groups={groups}, dtype={compute_dtype})"


if __name__ == "__main__":
    key = jax.random.PRNGKey(0)
    k1, k2, k3, k4, k5 = jax.random.split(key, 5)

    # 1) Dense 3x3 conv (stem-like), f32 feed: validates GEMM path + BN fold exactly.
    _run_case(k1, N=2, Cin=4, H=16, W=16, Cout=8, K=3, stride=1, groups=1,
              compute_dtype=jnp.float32, atol=2e-4, rtol=2e-4)

    # 2) Dense 3x3, stride 2, bf16 MXU feed (f32 accumulation) — deliberate
    #    precision reduction vs the f32 reference, hence loose tolerance.
    _run_case(k2, N=2, Cin=4, H=16, W=16, Cout=8, K=3, stride=2, groups=1,
              compute_dtype=jnp.bfloat16, atol=5e-2, rtol=5e-2)

    # 3) Depthwise 3x3 (groups == channels), f32: validates the VPU tap kernel.
    _run_case(k3, N=2, Cin=8, H=16, W=16, Cout=8, K=3, stride=1, groups=8,
              compute_dtype=jnp.float32, atol=2e-4, rtol=2e-4)

    # 4) Depthwise 5x5, bf16 (LCNetv3-style large-kernel DW conv).
    _run_case(k4, N=2, Cin=16, H=16, W=16, Cout=16, K=5, stride=1, groups=16,
              compute_dtype=jnp.bfloat16, atol=5e-2, rtol=5e-2)

    # 5) Depthwise stride 2 -> grouped block-diagonal GEMM fallback path.
    _run_case(k5, N=2, Cin=8, H=16, W=16, Cout=8, K=3, stride=2, groups=8,
              compute_dtype=jnp.bfloat16, atol=5e-2, rtol=5e-2)

    print("KERNEL_OK")
</pallas_src>

<mosaic_0001>
module attributes {stable_mosaic.version = 11 : i64} {
  func.func @_matmul_bn_kernel(%arg0: i32, %arg1: i32, %arg2: memref<256x128xf32, #tpu.memory_space<vmem>>, %arg3: memref<128x128xf32, #tpu.memory_space<vmem>>, %arg4: memref<1x128xf32, #tpu.memory_space<vmem>>, %arg5: memref<256x128xf32, #tpu.memory_space<vmem>>, %arg6: memref<256x128xf32, #tpu.memory_space<vmem>>) attributes {dimension_semantics = [#tpu.dimension_semantics<parallel>, #tpu.dimension_semantics<arbitrary>], iteration_bounds = array<i64: 2, 1>, scalar_prefetch = 0 : i64, scratch_operands = 1 : i64, tpu.core_type = #tpu.core_type<tc>, window_params = [{transform_indices = @transform_0, window_bounds = array<i64: 256, 128>}, {pipeline_mode = #tpu.pipeline_mode<synchronous>, transform_indices = @transform_1, window_bounds = array<i64: 128, 128>}, {pipeline_mode = #tpu.pipeline_mode<synchronous>, transform_indices = @transform_2, window_bounds = array<i64: 1, 128>}, {transform_indices = @transform_3, window_bounds = array<i64: 256, 128>}]} {
    %c0_i32 = arith.constant 0 : i32
    %0 = arith.cmpi eq, %arg1, %c0_i32 : i32
    %1 = arith.extui %0 : i1 to i32
    %c0_i32_0 = arith.constant 0 : i32
    %2 = arith.cmpi ne, %1, %c0_i32_0 : i32
    scf.if %2 {
      %cst_9 = arith.constant 0.000000e+00 : f32
      %15 = vector.broadcast %cst_9 : f32 to vector<256x128xf32>
      %c0_10 = arith.constant 0 : index
      %c0_11 = arith.constant 0 : index
      %16 = vector.load %arg6[%c0_10, %c0_11] : memref<256x128xf32, #tpu.memory_space<vmem>>, vector<256x128xf32>
      tpu.vector_store %arg6[%c0_10, %c0_11], %15 {strides = array<i32>} : memref<256x128xf32, #tpu.memory_space<vmem>>, vector<256x128xf32>,
    } else {
    }
    %c128_i32 = arith.constant 128 : i32
    %3 = arith.muli %arg1, %c128_i32 : i32
    %4 = tpu.assume_multiple %3, 128 : i32
    %c0 = arith.constant 0 : index
    %c0_1 = arith.constant 0 : index
    %5 = vector.load %arg6[%c0, %c0_1] : memref<256x128xf32, #tpu.memory_space<vmem>>, vector<256x128xf32>
    %c0_2 = arith.constant 0 : index
    %c0_3 = arith.constant 0 : index
    %6 = vector.load %arg2[%c0_2, %c0_3] : memref<256x128xf32, #tpu.memory_space<vmem>>, vector<256x128xf32>
    %7 = arith.index_cast %4 : i32 to index
    %c0_4 = arith.constant 0 : index
    %8 = vector.load %arg3[%7, %c0_4] : memref<128x128xf32, #tpu.memory_space<vmem>>, vector<128x128xf32>
    %cst = arith.constant dense<0.000000e+00> : vector<256x128xf32>
    %9 = tpu.matmul %6, %8, %cst {dimension_numbers = #tpu.dot_dimension_numbers<[1], [0], [0], [1], [0, 0, 1, 1], [], []>} : vector<256x128xf32>, vector<128x128xf32>, vector<256x128xf32> -> vector<256x128xf32>
    %10 = arith.addf %5, %9 : vector<256x128xf32>
    %c0_5 = arith.constant 0 : index
    %c0_6 = arith.constant 0 : index
    %11 = vector.load %arg6[%c0_5, %c0_6] : memref<256x128xf32, #tpu.memory_space<vmem>>, vector<256x128xf32>
    tpu.vector_store %arg6[%c0_5, %c0_6], %10 {strides = array<i32>} : memref<256x128xf32, #tpu.memory_space<vmem>>, vector<256x128xf32>,
    %c0_i32_7 = arith.constant 0 : i32
    %12 = arith.cmpi eq, %arg1, %c0_i32_7 : i32
    %13 = arith.extui %12 : i1 to i32
    %c0_i32_8 = arith.constant 0 : i32
    %14 = arith.cmpi ne, %13, %c0_i32_8 : i32
    scf.if %14 {
      %c0_9 = arith.constant 0 : index
      %c0_10 = arith.constant 0 : index
      %15 = vector.load %arg6[%c0_9, %c0_10] : memref<256x128xf32, #tpu.memory_space<vmem>>, vector<256x128xf32>
      %c0_11 = arith.constant 0 : index
      %c0_12 = arith.constant 0 : index
      %16 = vector.load %arg4[%c0_11, %c0_12] : memref<1x128xf32, #tpu.memory_space<vmem>>, vector<1x128xf32>
      %17 = vector.broadcast %16 : vector<1x128xf32> to vector<256x128xf32>
      %18 = arith.addf %15, %17 : vector<256x128xf32>
      %c0_13 = arith.constant 0 : index
      %c0_14 = arith.constant 0 : index
      %19 = vector.load %arg5[%c0_13, %c0_14] : memref<256x128xf32, #tpu.memory_space<vmem>>, vector<256x128xf32>
      tpu.vector_store %arg5[%c0_13, %c0_14], %18 {strides = array<i32>} : memref<256x128xf32, #tpu.memory_space<vmem>>, vector<256x128xf32>,
    } else {
    }
    return
  }
  func.func @transform_0(%arg0: i32, %arg1: i32) -> (i32, i32) {
    %c0_i32 = arith.constant 0 : i32
    return %arg0, %arg1 : i32, i32
  }
  func.func @transform_1(%arg0: i32, %arg1: i32) -> (i32, i32) {
    %c0_i32 = arith.constant 0 : i32
    %c0_i32_0 = arith.constant 0 : i32
    %c0_i32_1 = arith.constant 0 : i32
    return %c0_i32, %c0_i32_0 : i32, i32
  }
  func.func @transform_2(%arg0: i32, %arg1: i32) -> (i32, i32) {
    %c0_i32 = arith.constant 0 : i32
    %c0_i32_0 = arith.constant 0 : i32
    %c0_i32_1 = arith.constant 0 : i32
    return %c0_i32, %c0_i32_0 : i32, i32
  }
  func.func @transform_3(%arg0: i32, %arg1: i32) -> (i32, i32) {
    %c0_i32 = arith.constant 0 : i32
    %c0_i32_0 = arith.constant 0 : i32
    return %arg0, %c0_i32 : i32, i32
  }
}

</mosaic_0001>

<bundles_post_ra>
// kernel: tpu_custom_call.1
= control target key start
LH: loop header
LB: loop body
LE: loop exit
PB: predicated region body
PF: predicated region fallthrough
CT: control target
= control target key end

     0   :  { %8 = vsyncpa [#allocation4], 0  ;;  %s1624_s0 = inlined_call_operand.hbm [shape: f32[512,128], index: 0, kind: input, shape index: {}]   ;;  %s1625_s1 = inlined_call_operand.hbm [shape: f32[128,128], index: 1, kind: input, shape index: {}]   ;;  %s1626_s2 = inlined_call_operand.vmem [shape: f32[1,128], index: 2, kind: input, shape index: {}]   ;;  %s1627_s3 = inlined_call_operand.hbm [shape: f32[512,128], index: 3, kind: output, shape index: {}]  }
   0x1   :  { %10 = vsyncpa [#allocation4 + $0x1], 0 }
   0x2   :  { %11 = vsyncpa [#allocation7], 0 }
   0x3   :  { %12 = vsyncpa [#allocation5], 0 }
   0x4   :  { %14 = vsyncpa [#allocation5 + $0x1], 0  ;;  %s1289_s12 = smov 0   ;;  %s1291_s13 = smov 0  }
   0x5   :  { %s1293_s14 = smov 0   ;;  %s1295_s15 = smov 0  }
   0x6   :  { %s1297_s16 = smov 0   ;;  %s1299_s17 = smov 0  }
   0x7 LB: > { %s843_s18 = sadd.s32 4294967295, %s1260_s17   ;;  %s844_s19 = sadd.s32 4294967294, %s1260_s17   ;;  %s1260_s17 = sphi %s1299_s17, %s20_s17   ;;  %s1256_s16 = sphi %s1297_s16, %s1651_s16   ;;  %s1252_s15 = sphi %s1295_s15, %s1650_s15   ;;  %s1248_s14 = sphi %s1293_s14, %s1649_s14   ;;  %s1244_s13 = sphi %s1291_s13, %s1648_s13   ;;  %s1240_s12 = sphi %s1289_s12, %s1647_s12  }
   0x8   : > { %p54_p0 = scmp.ne.s32.totalorder %s1244_s13, %s1240_s12  ;;  %p1323_p1 = scmp.eq.s32.totalorder %s843_s18, 0 }
   0x9   : > { %p1327_p2 = scmp.eq.s32.totalorder %s843_s18, 1  ;;  %p126_p3 = scmp.eq.s32.totalorder %s844_s19, 1 }
   0xa   : > { %s1632_s20 = scalar_select %p1323_p1, 1, 0 }
   0xb   : > { %s1633_s21 = scalar_select %p1327_p2, 1, 0 }
   0xc   : > { %p1333_p4 = por %p1323_p1, %p54_p0  ;;  %p845_p5 = scmp.ge.s32.totalorder %s1260_s17, 1 }
   0xd   : > { %p1338_p6 = por %p126_p3, %p54_p0  ;;  %p133_p7 = scmp.lt.s32.totalorder %s1260_s17, 3 }
   0xe   : > { %s1634_s22 = scalar_select %p1333_p4, 1, 0 }
   0xf   : > { %s1635_s23 = scalar_select %p1338_p6, 1, 0 }
  0x10   : > { %p1343_p8 = pnand %p845_p5, %p133_p7  ;;  %s1262_s25 = smov [#allocation6]  }
  0x11   : > { %s145_s26 = sshll.u32 %s1262_s25, 4  ;;  %s32_s28 = sadd.s32 1, %s1256_s16  ;;  %s146_s26 = int_to_ptr.vmem [resolvable:$true] %s145_s26 }
  0x12   : > { %s1636_s24 = scalar_select %p1343_p8, 1, 0 }
  0x13   : > { %p1047_p9 = pneg %p1343_p8  ;;  %s1116_s4 = scalar_lea.hbm %s1625_s1, 2048 }
  0x14   : > { %p1117_p12 = scmp.ne.s32.totalorder %s1625_s1, %s1116_s4  ;;  %p1123_p5 = scmp.lt.u32.totalorder %s1116_s4, %s1625_s1 }
  0x15   : > { %p1352_p11 = pnand %p1047_p9, %p1323_p1 }
  0x17   : > { %p1118_p13 = pneg %p1352_p11 }
  0x19   : > { %p1119_p0 = pnand %p1118_p13, %p1117_p12 }
  0x1b   : > { %p1120_p3 = pneg %p1119_p0 }
  0x1d   : > { %p1125_p7 = pnand %p1123_p5, %p1120_p3 }
  0x1f   : > { %1128 = shalt.err (!%p1125_p7)
}
  0x20   : > { %s1129_s9 = scalar_lea.vmem %s146_s26, 2048  ;;  %p1137_p1 = scmp.lt.s32.totalorder %s146_s26, %s146_s26 }
  0x21   : > { %p1130_p9 = scmp.ne.s32.totalorder %s146_s26, %s1129_s9  ;;  %p1138_p4 = scmp.lt.s32.totalorder %s1129_s9, %s1129_s9 }
  0x23   : > { %p1132_p10 = pnand %p1130_p9, %p1118_p13  ;;  %p1139_p8 = por %p1138_p4, %p1137_p1 }
  0x25   : > { %p1133_p6 = pneg %p1132_p10 }
  0x27   : > { %p1140_p2 = pnand %p1139_p8, %p1133_p6 }
  0x29   : > { %1143 = shalt.err (!%p1140_p2)
}
  0x2a   : > { %s1263_s10 = smov 128   ;;  %s1264_s11 = smov 8  }
  0x2b   : > { %1050 = dma.hbm_to_vmem [thread:$0]  (!%p1352_p11), %s1625_s1, 2048, %s146_s26, [#allocation7], %s1263_s10, %s1263_s10, %s1264_s11  }
  0x2c   : > { %p34_p1 = scmp.ge.s32.totalorder %s32_s28, 2  ;;  %s41_s25 = sadd.s32 1, %s1248_s14 }
  0x2d   : > { %p48_p2 = scmp.ne.s32.totalorder %s1248_s14, %s1244_s13  ;;  %p49_p4 = scmp.eq.s32.totalorder %s1260_s17, 0 }
  0x2e   : > { %s1653_s28 = smov (%p34_p1, %s32_s28), 0  ;;  %p1639_p8 = scmp.ne.s32.totalorder %s1633_s21, 0 }
  0x2f   : > { %p1382_p6 = por %p49_p4, %p48_p2  ;;  %s36_s30 = ssub.s32 %s1256_s16, %s1653_s28 }
  0x30   : > { %p1388_p10 = por %p1639_p8, %p48_p2  ;;  %p1060_p12 = scmp.lt.s32.totalorder %s1260_s17, 2 }
  0x31   : > { %p39_p11 = scmp.eq.s32.totalorder %s36_s30, 0  ;;  %s162_s26 = sand.u32 1, %s1248_s14  }
  0x32   : > { %s848_s4 = sshll.u32 %s162_s26, 8  ;;  %s861_s6 = sshll.u32 %s1256_s16, 12 }
  0x33   : > { %s1397_s5 = scalar_select %p39_p11, %s1248_s14, %s41_s25  }
  0x34   : > { %s1403_s9 = scalar_lea.hbm %s1624_s0, %s861_s6  ;;  %s166_s21 = scalar_lea.vmem [#allocation3], %s848_s4 }
  0x35   : > { %s174_s18 = sshll.u32 %s166_s21, 4  ;;  %p1409_p13 = pnand %p1060_p12, %p1382_p6  ;;  %s1405_s18 = int_to_ptr.vmem [resolvable:$true] %s174_s18 }
  0x36   : > { %s1413_s25 = scalar_lea.sflag [#allocation4], %s162_s26  ;;  %s1144_s30 = scalar_lea.hbm %s1403_s9, 4096 }
  0x37   : > { %p1145_p0 = scmp.ne.s32.totalorder %s1403_s9, %s1144_s30  ;;  %p1146_p3 = pneg %p1409_p13 }
  0x38   : > { %s1149_s29 = scalar_lea.hbm %s1624_s0, 8192  ;;  %p1150_p9 = scmp.lt.u32.totalorder %s1403_s9, %s1624_s0 }
  0x39   : > { %p1147_p5 = pnand %p1146_p3, %p1145_p0  ;;  %p1151_p1 = scmp.lt.u32.totalorder %s1149_s29, %s1144_s30 }
  0x3a   : > { %p1153_p4 = scmp.lt.u32.totalorder %s1144_s30, %s1403_s9 }
  0x3b   : > { %p1148_p7 = pneg %p1147_p5  ;;  %p1152_p2 = por %p1151_p1, %p1150_p9 }
  0x3d   : > { %p1154_p6 = por %p1153_p4, %p1152_p2 }
  0x3f   : > { %p1155_p8 = pnand %p1154_p6, %p1148_p7 }
  0x41   : > { %1158 = shalt.err (!%p1155_p8)
}
  0x42   : > { %s1159_s26 = scalar_lea.vmem %s1405_s18, 4096  ;;  %s1265_s21 = smov [#allocation3]  }
  0x43   : > { %p1160_p12 = scmp.ne.s32.totalorder %s1405_s18, %s1159_s26  ;;  %s1164_s4 = sshll.u32 %s1265_s21, 4  ;;  %s1165_s4 = int_to_ptr.vmem [resolvable:$false] %s1164_s4 }
  0x44   : > { %s1166_s6 = scalar_lea.vmem %s1165_s4, 8192  ;;  %p1167_p5 = scmp.lt.s32.totalorder %s1405_s18, %s1165_s4 }
  0x45   : > { %p1162_p11 = pnand %p1160_p12, %p1146_p3  ;;  %p1168_p9 = scmp.lt.s32.totalorder %s1166_s6, %s1159_s26 }
  0x47   : > { %p1163_p0 = pneg %p1162_p11  ;;  %p1169_p1 = por %p1168_p9, %p1167_p5 }
  0x49   : > { %p1170_p2 = pnand %p1169_p1, %p1163_p0 }
  0x4b   : > { %1173 = shalt.err (!%p1170_p2)
}
  0x4c   : > { %1054 = dma.hbm_to_vmem [thread:$0]  (!%p1409_p13), %s1403_s9, 4096, %s1405_s18, %s1413_s25, %s1263_s10, %s1263_s10, %s1264_s11  }
  0x4d   : > { %p1642_p3 = scmp.ne.s32.totalorder %s1636_s24, 0 }
  0x4e   : > { %s1447_s30 = sand.u32 (!%p1642_p3), 1, %s1244_s13   ;;  %p1643_p7 = scmp.ne.s32.totalorder (!%p1642_p3), %s1634_s22, 0 }
  0x4f   : > { %186 = sbr.rel (%p1642_p3) target bundleno = 383 (0x17f), region = 32  ;;  %s852_s29 = sshll.u32 (!%p1642_p3), %s1447_s30, 8 }
  0x50   : > { %s189_s7 = scalar_lea.sflag (!%p1642_p3), [#allocation4], %s1447_s30  ;;  %s1453_s19 = scalar_lea.vmem (!%p1642_p3), [#allocation3], %s852_s29 }
  0x56   : > { %1227 = dma.done.wait (%p1643_p7), %s189_s7, 4096  }
  0x57   : > { %1229 = vsyncadd (%p1643_p7), %s189_s7, 4294963200  ;;  %p1644_p13 = scmp.ne.s32.totalorder %s1632_s20, 0 }
  0x59   : > { %1231 = dma.done.wait (%p1644_p13), [#allocation7], 2048  }
  0x5a   : > { %1233 = vsyncadd (%p1644_p13), [#allocation7], 4294965248  ;;  %v323_v0 = vld [vmem:[#allocation6] sm:$0xff]  ;;  %v324_v1 = vld [vmem:[#allocation6 + $0x8] sm:$0xff]  ;;  %s1506_s24 = scalar_lea.vmem [#allocation8], %s852_s29  ;;  %s862_s10 = sshll.u32 %s1252_s15, 12 }
  0x5b   : > { %v325_v2 = vld [vmem:[#allocation6 + $0x10] sm:$0xff]  ;;  %v991_v3 = vpack.c.bf16 %v324_v1, %v323_v0  ;;  %v326_v4 = vld [vmem:[#allocation6 + $0x18] sm:$0xff]  ;;  %v327_v6 = vld [vmem:[#allocation6 + $0x20] sm:$0xff]  ;;  %s748_s11 = sshll.u32 %s1506_s24, 4  ;;  %s1567_s18 = scalar_lea.hbm %s1627_s3, %s862_s10  ;;  %s1569_s11 = int_to_ptr.vmem [resolvable:$true] %s748_s11 }
  0x5c   : > { %v995_v5 = vpack.c.bf16 %v326_v4, %v325_v2  ;;  %v328_v7 = vld [vmem:[#allocation6 + $0x28] sm:$0xff]  ;;  %v290_v9 = vld [vmem:[%s1453_s19] sm:$0xff]  ;;  %v329_v11 = vld [vmem:[#allocation6 + $0x30] sm:$0xff]  ;;  %s735_s25 = scalar_lea.sflag [#allocation5], %s1447_s30  ;;  %s1174_s8 = scalar_lea.vmem %s1569_s11, 4096 }
  0x5d   : > { %992 = vmatprep.subr.bf16.mxu0 %v991_v3  ;;  %1023 = vmatprep.subr.bf16.mxu1 %v991_v3  ;;  %v999_v8 = vpack.c.bf16 %v328_v7, %v327_v6  ;;  %v306_v10 = vld [vmem:[%s1453_s19 + $0x80] sm:$0xff]  ;;  %v330_v12 = vld [vmem:[#allocation6 + $0x38] sm:$0xff]  ;;  %v332_v15 = vld [vmem:[#allocation6 + $0x48] sm:$0xff]  ;;  %p1175_p4 = scmp.ne.s32.totalorder %s1569_s11, %s1174_s8  ;;  %s1266_s26 = smov [#allocation8]  }
  0x5e   : > { %994 = vmatpush3.bf16.msra.mxu0 %v991_v3  ;;  %1031 = vmatpush3.bf16.msra.mxu1 %v991_v3  ;;  %v1003_v13 = vpack.c.bf16 %v330_v12, %v329_v11  ;;  %v331_v14 = vld [vmem:[#allocation6 + $0x40] sm:$0xff]  ;;  %v333_v17 = vld [vmem:[#allocation6 + $0x50] sm:$0xff]  ;;  %v334_v18 = vld [vmem:[#allocation6 + $0x58] sm:$0xff]  ;;  %s1178_s21 = sshll.u32 %s1266_s26, 4  ;;  %s1179_s21 = int_to_ptr.vmem [resolvable:$false] %s1178_s21 }
  0x5f   : > { %996 = vmatprep.subr.bf16.mxu0 %v995_v5  ;;  %1024 = vmatprep.subr.bf16.mxu1 %v995_v5  ;;  %v1007_v16 = vpack.c.bf16 %v332_v15, %v331_v14  ;;  %v1011_v19 = vpack.c.bf16 %v334_v18, %v333_v17  ;;  %v335_v20 = vld [vmem:[#allocation6 + $0x60] sm:$0xff]  ;;  %v336_v21 = vld [vmem:[#allocation6 + $0x68] sm:$0xff]  ;;  %v337_v23 = vld [vmem:[#allocation6 + $0x70] sm:$0xff]  ;;  %p1176_p6 = pnand %p1175_p4, %p1388_p10  ;;  %s1180_s4 = scalar_lea.vmem %s1179_s21, 8192 }
  0x60   : > { %943 = vmatprep.mubr.f32.mxu0 %v290_v9  ;;  %967 = vmatprep.mubr.f32.mxu1 %v306_v10  ;;  %v1015_v22 = vpack.c.bf16 %v336_v21, %v335_v20  ;;  %v338_v24 = vld [vmem:[#allocation6 + $0x78] sm:$0xff]  ;;  %v291_v26 = vld [vmem:[%s1453_s19 + $0x8] sm:$0xff]  ;;  %v292_v28 = vld [vmem:[%s1453_s19 + $0x10] sm:$0xff]  ;;  %p1181_p12 = scmp.lt.s32.totalorder %s1569_s11, %s1179_s21  ;;  %p1182_p11 = scmp.lt.s32.totalorder %s1180_s4, %s1174_s8 }
  0x61   : > { %v1019_v25 = vpack.c.bf16 %v338_v24, %v337_v23  ;;  %v307_v27 = vld [vmem:[%s1453_s19 + $0x88] sm:$0xff]  ;;  %v308_v29 = vld [vmem:[%s1453_s19 + $0x90] sm:$0xff]  ;;  %v293_v30 = vld [vmem:[%s1453_s19 + $0x18] sm:$0xff]  ;;  %p1177_p8 = pneg %p1176_p6 }
  0x62   : > { %998 = vmatpush3.bf16.msra.mxu0 %v995_v5  ;;  %1032 = vmatpush3.bf16.msra.mxu1 %v995_v5  ;;  %v309_v31 = vld [vmem:[%s1453_s19 + $0x98] sm:$0xff]  ;;  %v294_v32 = vld [vmem:[%s1453_s19 + $0x20] sm:$0xff]  ;;  %v295_v34 = vld [vmem:[%s1453_s19 + $0x28] sm:$0xff]  ;;  %p1183_p0 = por %p1182_p11, %p1181_p12 }
  0x63   : > { %1000 = vmatprep.subr.bf16.mxu0 %v999_v8  ;;  %1025 = vmatprep.subr.bf16.mxu1 %v999_v8  ;;  %v310_v33 = vld [vmem:[%s1453_s19 + $0xa0] sm:$0xff]  ;;  %v311_v35 = vld [vmem:[%s1453_s19 + $0xa8] sm:$0xff]  ;;  %v296_v36 = vld [vmem:[%s1453_s19 + $0x30] sm:$0xff] }
  0x64   : > { %v312_v37 = vld [vmem:[%s1453_s19 + $0xb0] sm:$0xff]  ;;  %v297_v38 = vld [vmem:[%s1453_s19 + $0x38] sm:$0xff]  ;;  %v298_v40 = vld [vmem:[%s1453_s19 + $0x40] sm:$0xff]  ;;  %p1184_p5 = pnand %p1183_p0, %p1177_p8 }
  0x65   : > { %v313_v39 = vld [vmem:[%s1453_s19 + $0xb8] sm:$0xff]  ;;  %v314_v41 = vld [vmem:[%s1453_s19 + $0xc0] sm:$0xff]  ;;  %v299_v42 = vld [vmem:[%s1453_s19 + $0x48] sm:$0xff] }
  0x66   : > { %1002 = vmatpush3.bf16.msra.mxu0 %v999_v8  ;;  %1033 = vmatpush3.bf16.msra.mxu1 %v999_v8  ;;  %v315_v43 = vld [vmem:[%s1453_s19 + $0xc8] sm:$0xff]  ;;  %v300_v44 = vld [vmem:[%s1453_s19 + $0x50] sm:$0xff]  ;;  %v301_v46 = vld [vmem:[%s1453_s19 + $0x58] sm:$0xff] }
  0x67   : > { %1004 = vmatprep.subr.bf16.mxu0 %v1003_v13  ;;  %1026 = vmatprep.subr.bf16.mxu1 %v1003_v13  ;;  %v316_v45 = vld [vmem:[%s1453_s19 + $0xd0] sm:$0xff]  ;;  %v317_v47 = vld [vmem:[%s1453_s19 + $0xd8] sm:$0xff]  ;;  %v302_v48 = vld [vmem:[%s1453_s19 + $0x60] sm:$0xff] }
  0x68   : > { %v318_v49 = vld [vmem:[%s1453_s19 + $0xe0] sm:$0xff]  ;;  %v303_v50 = vld [vmem:[%s1453_s19 + $0x68] sm:$0xff]  ;;  %v304_v52 = vld [vmem:[%s1453_s19 + $0x70] sm:$0xff] }
  0x69   : > { %v319_v51 = vld [vmem:[%s1453_s19 + $0xe8] sm:$0xff]  ;;  %v320_v53 = vld [vmem:[%s1453_s19 + $0xf0] sm:$0xff]  ;;  %v305_v54 = vld [vmem:[%s1453_s19 + $0x78] sm:$0xff] }
  0x6a   : > { %1006 = vmatpush3.bf16.msra.mxu0 %v1003_v13  ;;  %1034 = vmatpush3.bf16.msra.mxu1 %v1003_v13  ;;  %v321_v55 = vld [vmem:[%s1453_s19 + $0xf8] sm:$0xff]  ;;  %v1498_v56 = vld [vmem:[%s1626_s2] ss:$0 sm:$0xff] }
  0x6b   : > { %1008 = vmatprep.subr.bf16.mxu0 %v1007_v16  ;;  %1027 = vmatprep.subr.bf16.mxu1 %v1007_v16 }
  0x6e   : > { %1010 = vmatpush3.bf16.msra.mxu0 %v1007_v16  ;;  %1035 = vmatpush3.bf16.msra.mxu1 %v1007_v16 }
  0x6f   : > { %1012 = vmatprep.subr.bf16.mxu0 %v1011_v19  ;;  %1028 = vmatprep.subr.bf16.mxu1 %v1011_v19 }
  0x72   : > { %1014 = vmatpush3.bf16.msra.mxu0 %v1011_v19  ;;  %1036 = vmatpush3.bf16.msra.mxu1 %v1011_v19 }
  0x73   : > { %1016 = vmatprep.subr.bf16.mxu0 %v1015_v22  ;;  %1029 = vmatprep.subr.bf16.mxu1 %v1015_v22 }
  0x76   : > { %1018 = vmatpush3.bf16.msra.mxu0 %v1015_v22  ;;  %1037 = vmatpush3.bf16.msra.mxu1 %v1015_v22 }
  0x77   : > { %1020 = vmatprep.subr.bf16.mxu0 %v1019_v25  ;;  %1030 = vmatprep.subr.bf16.mxu1 %v1019_v25 }
  0x7a   : > { %1022 = vmatpush3.bf16.msra.mxu0 %v1019_v25  ;;  %1038 = vmatpush3.bf16.msra.mxu1 %v1019_v25 }
  0x7d   : > { %944 = vmatmul.mubr.f32.vlgmr.msra.gmra.mrb[0].mxu0 %v291_v26  ;;  %968 = vmatmul.mubr.f32.vlgmr.msra.gmra.mrb[0].mxu1 %v307_v27 }
  0x7e   : > { %946 = vmatprep.mubr.f32.mxu0 %v292_v28  ;;  %970 = vmatprep.mubr.f32.mxu1 %v308_v29 }
  0x81   : > { %947 = vmatmul.mubr.f32.gmra.mrb[2].mxu0 %v293_v30  ;;  %971 = vmatmul.mubr.f32.gmra.mrb[2].mxu1 %v309_v31 }
  0x82   : > { %949 = vmatprep.mubr.f32.mxu0 %v294_v32  ;;  %973 = vmatprep.mubr.f32.mxu1 %v310_v33 }
  0x85   : > { %950 = vmatmul.mubr.f32.gmra.mrb[4].mxu0 %v295_v34  ;;  %974 = vmatmul.mubr.f32.gmra.mrb[4].mxu1 %v311_v35 }
  0x86   : > { %952 = vmatprep.mubr.f32.mxu0 %v296_v36  ;;  %976 = vmatprep.mubr.f32.mxu1 %v312_v37 }
  0x89   : > { %953 = vmatmul.mubr.f32.gmra.mrb[6].mxu0 %v297_v38  ;;  %977 = vmatmul.mubr.f32.gmra.mrb[6].mxu1 %v313_v39 }
  0x8a   : > { %955 = vmatprep.mubr.f32.mxu0 %v298_v40  ;;  %979 = vmatprep.mubr.f32.mxu1 %v314_v41 }
  0x8d   : > { %956 = vmatmul.mubr.f32.gmra.mrb[8].mxu0 %v299_v42  ;;  %980 = vmatmul.mubr.f32.gmra.mrb[8].mxu1 %v315_v43 }
  0x8e   : > { %958 = vmatprep.mubr.f32.mxu0 %v300_v44  ;;  %982 = vmatprep.mubr.f32.mxu1 %v316_v45 }
  0x91   : > { %959 = vmatmul.mubr.f32.gmra.mrb[10].mxu0 %v301_v46  ;;  %983 = vmatmul.mubr.f32.gmra.mrb[10].mxu1 %v317_v47 }
  0x92   : > { %961 = vmatprep.mubr.f32.mxu0 %v302_v48  ;;  %985 = vmatprep.mubr.f32.mxu1 %v318_v49 }
  0x95   : > { %962 = vmatmul.mubr.f32.gmra.mrb[12].mxu0 %v303_v50  ;;  %986 = vmatmul.mubr.f32.gmra.mrb[12].mxu1 %v319_v51 }
  0x96   : > { %964 = vmatprep.mubr.f32.mxu0 %v304_v52  ;;  %988 = vmatprep.mubr.f32.mxu1 %v320_v53 }
  0x99   : > { %965 = vmatmul.mubr.f32.gmra.mrb[14].mxu0 %v305_v54  ;;  %989 = vmatmul.mubr.f32.gmra.mrb[14].mxu1 %v321_v55 }
 0x150   : > { %v945_v57 = vpop.f32.mrb[0].mxu0  ;;  %v969_v58 = vpop.f32.mrb[0].mxu1 }
 0x151   : > { %v671_v59 = vadd.f32 %v945_v57, %v1498_v56  ;;  %v687_v60 = vadd.f32 %v969_v58, %v1498_v56  ;;  %v405_v61 = vpop.f32.mrb[1].mxu0  ;;  %v485_v62 = vpop.f32.mrb[1].mxu1 }
 0x152   : > { %v670_v63 = vadd.f32 %v1498_v56, %v405_v61  ;;  %v686_v0 = vadd.f32 %v1498_v56, %v485_v62 }
 0x153   : > { %703 = vst [vmem:[%s1506_s24 + $0x8] sm:$0xff] %v671_v59  ;;  %719 = vst [vmem:[%s1506_s24 + $0x88] sm:$0xff] %v687_v60 }
 0x154   : > { %702 = vst [vmem:[%s1506_s24] sm:$0xff] %v670_v63  ;;  %718 = vst [vmem:[%s1506_s24 + $0x80] sm:$0xff] %v686_v0  ;;  %v948_v1 = vpop.f32.mrb[2].mxu0  ;;  %v972_v2 = vpop.f32.mrb[2].mxu1 }
 0x155   : > { %v673_v3 = vadd.f32 %v948_v1, %v1498_v56  ;;  %v689_v4 = vadd.f32 %v972_v2, %v1498_v56  ;;  %v415_v5 = vpop.f32.mrb[3].mxu0  ;;  %v495_v6 = vpop.f32.mrb[3].mxu1 }
 0x156   : > { %v672_v7 = vadd.f32 %v1498_v56, %v415_v5  ;;  %v688_v8 = vadd.f32 %v1498_v56, %v495_v6 }
 0x157   : > { %705 = vst [vmem:[%s1506_s24 + $0x18] sm:$0xff] %v673_v3  ;;  %721 = vst [vmem:[%s1506_s24 + $0x98] sm:$0xff] %v689_v4 }
 0x158   : > { %704 = vst [vmem:[%s1506_s24 + $0x10] sm:$0xff] %v672_v7  ;;  %720 = vst [vmem:[%s1506_s24 + $0x90] sm:$0xff] %v688_v8  ;;  %v951_v9 = vpop.f32.mrb[4].mxu0  ;;  %v975_v10 = vpop.f32.mrb[4].mxu1 }
 0x159   : > { %v675_v11 = vadd.f32 %v951_v9, %v1498_v56  ;;  %v691_v12 = vadd.f32 %v975_v10, %v1498_v56  ;;  %v425_v13 = vpop.f32.mrb[5].mxu0  ;;  %v505_v14 = vpop.f32.mrb[5].mxu1 }
 0x15a   : > { %v674_v15 = vadd.f32 %v1498_v56, %v425_v13  ;;  %v690_v16 = vadd.f32 %v1498_v56, %v505_v14 }
 0x15b   : > { %707 = vst [vmem:[%s1506_s24 + $0x28] sm:$0xff] %v675_v11  ;;  %723 = vst [vmem:[%s1506_s24 + $0xa8] sm:$0xff] %v691_v12 }
 0x15c   : > { %706 = vst [vmem:[%s1506_s24 + $0x20] sm:$0xff] %v674_v15  ;;  %722 = vst [vmem:[%s1506_s24 + $0xa0] sm:$0xff] %v690_v16  ;;  %v954_v17 = vpop.f32.mrb[6].mxu0  ;;  %v978_v18 = vpop.f32.mrb[6].mxu1 }
 0x15d   : > { %v677_v19 = vadd.f32 %v954_v17, %v1498_v56  ;;  %v693_v20 = vadd.f32 %v978_v18, %v1498_v56  ;;  %v435_v21 = vpop.f32.mrb[7].mxu0  ;;  %v515_v22 = vpop.f32.mrb[7].mxu1 }
 0x15e   : > { %v676_v23 = vadd.f32 %v1498_v56, %v435_v21  ;;  %v692_v24 = vadd.f32 %v1498_v56, %v515_v22 }
 0x15f   : > { %709 = vst [vmem:[%s1506_s24 + $0x38] sm:$0xff] %v677_v19  ;;  %725 = vst [vmem:[%s1506_s24 + $0xb8] sm:$0xff] %v693_v20 }
 0x160   : > { %708 = vst [vmem:[%s1506_s24 + $0x30] sm:$0xff] %v676_v23  ;;  %724 = vst [vmem:[%s1506_s24 + $0xb0] sm:$0xff] %v692_v24  ;;  %v957_v25 = vpop.f32.mrb[8].mxu0  ;;  %v981_v26 = vpop.f32.mrb[8].mxu1 }
 0x161   : > { %v679_v27 = vadd.f32 %v957_v25, %v1498_v56  ;;  %v695_v28 = vadd.f32 %v981_v26, %v1498_v56  ;;  %v445_v29 = vpop.f32.mrb[9].mxu0  ;;  %v525_v30 = vpop.f32.mrb[9].mxu1 }
 0x162   : > { %v678_v31 = vadd.f32 %v1498_v56, %v445_v29  ;;  %v694_v32 = vadd.f32 %v1498_v56, %v525_v30 }
 0x163   : > { %711 = vst [vmem:[%s1506_s24 + $0x48] sm:$0xff] %v679_v27  ;;  %727 = vst [vmem:[%s1506_s24 + $0xc8] sm:$0xff] %v695_v28 }
 0x164   : > { %710 = vst [vmem:[%s1506_s24 + $0x40] sm:$0xff] %v678_v31  ;;  %726 = vst [vmem:[%s1506_s24 + $0xc0] sm:$0xff] %v694_v32  ;;  %v960_v33 = vpop.f32.mrb[10].mxu0  ;;  %v984_v34 = vpop.f32.mrb[10].mxu1 }
 0x165   : > { %v681_v35 = vadd.f32 %v960_v33, %v1498_v56  ;;  %v697_v36 = vadd.f32 %v984_v34, %v1498_v56  ;;  %v455_v37 = vpop.f32.mrb[11].mxu0  ;;  %v535_v38 = vpop.f32.mrb[11].mxu1 }
 0x166   : > { %v680_v39 = vadd.f32 %v1498_v56, %v455_v37  ;;  %v696_v40 = vadd.f32 %v1498_v56, %v535_v38 }
 0x167   : > { %713 = vst [vmem:[%s1506_s24 + $0x58] sm:$0xff] %v681_v35  ;;  %729 = vst [vmem:[%s1506_s24 + $0xd8] sm:$0xff] %v697_v36 }
 0x168   : > { %712 = vst [vmem:[%s1506_s24 + $0x50] sm:$0xff] %v680_v39  ;;  %728 = vst [vmem:[%s1506_s24 + $0xd0] sm:$0xff] %v696_v40  ;;  %v963_v41 = vpop.f32.mrb[12].mxu0  ;;  %v987_v42 = vpop.f32.mrb[12].mxu1 }
 0x169   : > { %v683_v43 = vadd.f32 %v963_v41, %v1498_v56  ;;  %v699_v44 = vadd.f32 %v987_v42, %v1498_v56  ;;  %v465_v45 = vpop.f32.mrb[13].mxu0  ;;  %v545_v46 = vpop.f32.mrb[13].mxu1 }
 0x16a   : > { %v682_v47 = vadd.f32 %v1498_v56, %v465_v45  ;;  %v698_v48 = vadd.f32 %v1498_v56, %v545_v46 }
 0x16b   : > { %715 = vst [vmem:[%s1506_s24 + $0x68] sm:$0xff] %v683_v43  ;;  %731 = vst [vmem:[%s1506_s24 + $0xe8] sm:$0xff] %v699_v44 }
 0x16c   : > { %714 = vst [vmem:[%s1506_s24 + $0x60] sm:$0xff] %v682_v47  ;;  %730 = vst [vmem:[%s1506_s24 + $0xe0] sm:$0xff] %v698_v48  ;;  %v966_v49 = vpop.f32.mrb[14].mxu0  ;;  %v990_v50 = vpop.f32.mrb[14].mxu1 }
 0x16d   : > { %v685_v51 = vadd.f32 %v966_v49, %v1498_v56  ;;  %v701_v52 = vadd.f32 %v990_v50, %v1498_v56  ;;  %v475_v53 = vpop.f32.mrb[15].mxu0  ;;  %v555_v54 = vpop.f32.mrb[15].mxu1 }
 0x16e   : > { %v684_v55 = vadd.f32 %v1498_v56, %v475_v53  ;;  %v700_v57 = vadd.f32 %v1498_v56, %v555_v54 }
 0x16f   : > { %717 = vst [vmem:[%s1506_s24 + $0x78] sm:$0xff] %v685_v51  ;;  %733 = vst [vmem:[%s1506_s24 + $0xf8] sm:$0xff] %v701_v52 }
 0x170   : > { %716 = vst [vmem:[%s1506_s24 + $0x70] sm:$0xff] %v684_v55  ;;  %732 = vst [vmem:[%s1506_s24 + $0xf0] sm:$0xff] %v700_v57 }
 0x171   : > { %1187 = shalt.err (!%p1184_p5)
}
 0x172   : > { %s1188_s6 = scalar_lea.hbm %s1567_s18, 4096  ;;  %s1192_s19 = scalar_lea.hbm %s1627_s3, 8192 }
 0x173   : > { %p1189_p9 = scmp.ne.s32.totalorder %s1567_s18, %s1188_s6  ;;  %p1193_p3 = scmp.lt.u32.totalorder %s1567_s18, %s1627_s3 }
 0x174   : > { %p1194_p7 = scmp.lt.u32.totalorder %s1192_s19, %s1188_s6  ;;  %p1196_p4 = scmp.lt.u32.totalorder %s1188_s6, %s1567_s18 }
 0x175   : > { %p1190_p1 = pnand %p1189_p9, %p1388_p10 }
 0x176   : > { %p1195_p13 = por %p1194_p7, %p1193_p3 }
 0x177   : > { %p1191_p2 = pneg %p1190_p1 }
 0x178   : > { %p1197_p6 = por %p1196_p4, %p1195_p13 }
 0x17a   : > { %p1198_p8 = pnand %p1197_p6, %p1191_p2 }
 0x17c   : > { %1201 = shalt.err (!%p1198_p8)
}
 0x17d   : > { %s1267_s24 = smov 128   ;;  %s1268_s10 = smov 8  }
 0x17e   : > { %1045 = dma.vmem_to_hbm [thread:$0]  (%p1388_p10), %s1569_s11, 4096, %s1567_s18, %s735_s25, %s1267_s24, %s1267_s24, %s1268_s10  }
 0x17f PF: > { %s763_s15 = sand.u32 1, %s1240_s12   ;;  %p1645_p12 = scmp.ne.s32.totalorder %s1635_s23, 0 }
 0x180   : > { %p1646_p11 = scmp.ge.s32.totalorder %s1260_s17, 2  ;;  %s764_s9 = scalar_lea.sflag [#allocation5], %s763_s15 }
 0x182   : > { %p1056_p0 = pnand %p1646_p11, %p1645_p12 }
 0x184   : > { %1235 = dma.done.wait (!%p1056_p0), %s764_s9, 4096  }
 0x185   : > { %1237 = vsyncadd (!%p1056_p0), %s764_s9, 4294963200  ;;  %s20_s17 = sadd.s32 1, %s1260_s17   ;;  %s1647_s12 = smov %s1244_s13 }
 0x186   : > { %p17_p5 = scmp.ge.s32.totalorder %s20_s17, 4   ;;  %s1648_s13 = smov %s1248_s14 }
 0x187   : > { %s1649_s14 = smov %s1397_s5  ;;  %s1650_s15 = smov %s1256_s16 }
 0x188   : > { %s1651_s16 = smov %s1653_s28  ;;  %19 = sbr.rel (!%p17_p5) target bundleno = 7 (0x7), region = 90 }
 0x18f   :  { %769 = vsyncpa [#allocation4], 1 }
 0x190   :  { %771 = vsyncpa [#allocation4 + $0x1], 1 }
 0x191   :  { %772 = vsyncpa [#allocation7], 1 }
 0x192   :  { %773 = vsyncpa [#allocation5], 1 }
 0x193   :  { %775 = vsyncpa [#allocation5 + $0x1], 1 }

</bundles_post_ra>
